<compile_context>
chip_gen: v5e
topology: v5e:2x2
jax: 0.10.0
libtpu: 0.0.40
codegen_flags: <defaults>
</compile_context>

<pallas_src>
import jax
import jax.numpy as jnp
from jax.experimental import pallas as pl
from jax.experimental.pallas import tpu as pltpu


def _q_mlp_kernel(s_ref, a_ref,
                  w1s_ref, w1c_ref, b1_ref,
                  w2_ref, b2_ref,
                  w3_ref, b3_ref,
                  o_ref):
    cdt = w1s_ref.dtype  # compute dtype for MXU inputs (bf16 by default)

    # Fused concat: split-K layer 1.
    #   (TB, S) @ (S, H) + (TB, C) @ (C, H)  ==  concat(s, a) @ w1
    s = s_ref[...].astype(cdt)
    a = a_ref[...].astype(cdt)
    h1 = jnp.dot(s, w1s_ref[...], preferred_element_type=jnp.float32)
    h1 = h1 + jnp.dot(a, w1c_ref[...], preferred_element_type=jnp.float32)
    h1 = jnp.maximum(h1 + b1_ref[...], 0.0)          # f32 elementwise (v5e-safe)

    # Layer 2: (TB, H) @ (H, H)
    h2 = jnp.dot(h1.astype(cdt), w2_ref[...], preferred_element_type=jnp.float32)
    h2 = jnp.maximum(h2 + b2_ref[...], 0.0)

    # Output head: (TB, H) @ (H, q_out) — stored unpadded (no wasted lanes in HBM).
    q = jnp.dot(h2.astype(cdt), w3_ref[...], preferred_element_type=jnp.float32)
    o_ref[...] = (q + b3_ref[...]).astype(o_ref.dtype)


def _round_up(x, m):
    return ((x + m - 1) // m) * m


def _pick_batch_tile(B, batch_tile, S, C, Q):
    """Choose the batch tile TB.

    * TB <= batch_tile (default 4096; sweep per generation if desired).
    * For large B, TB <= round_up(cdiv(B, 2), 8) so the grid has >= 2 blocks
      and the "parallel" axis can be sharded across v7x's two TensorCores.
    * TB capped so double-buffered, lane-padded activation tiles stay under a
      conservative ~24 MiB VMEM budget (safe for v7x's 64 MiB physical and for
      v5e/v6e once vmem_limit_bytes is raised).
    * Result is a multiple of 8 sublanes, or exactly B when B is small.
    """
    tb = min(batch_tile, _round_up(pl.cdiv(B, 2), 8))
    # f32 activations, lane-padded to 128 in VMEM, double-buffered in+out.
    row_bytes = 4 * 2 * (_round_up(S, 128) + _round_up(C, 128) + _round_up(Q, 128))
    vmem_cap_rows = max(8, ((24 << 20) // max(row_bytes, 1)) // 8 * 8)
    tb = min(tb, vmem_cap_rows)
    if tb >= B:
        tb = B  # single full-batch block (block dim == full array dim is legal)
    return tb


def q_forward(state, c_action, params, *, batch_tile=4096,
              vmem_limit_bytes=48 << 20, out_dtype=jnp.float32):
    """Q(state, action) forward pass.

    state:    (B, state_size)      float32
    c_action: (B, c_action_size)   float32
    params:   (w1_s, w1_c, b1, w2, b2, w3, b3)   -- w* bf16, b* f32, unpadded
    returns:  (B, q_out)           out_dtype
    """
    w1s, w1c, b1, w2, b2, w3, b3 = params

    B, S = state.shape
    C = c_action.shape[1]
    H = w1s.shape[1]
    Q = w3.shape[1]

    TB = _pick_batch_tile(B, batch_tile, S, C, Q)
    num_blocks = pl.cdiv(B, TB)

    act_spec = lambda feat: pl.BlockSpec((TB, feat), lambda i: (i, 0))
    fixed = lambda shape: pl.BlockSpec(shape, lambda i: (0, 0))  # VMEM-resident

    grid_spec = pl.GridSpec(
        grid=(num_blocks,),
        in_specs=[
            act_spec(S),        # state tile
            act_spec(C),        # c_action tile
            fixed((S, H)),      # w1_s   (resident across grid)
            fixed((C, H)),      # w1_c
            fixed((1, H)),      # b1
            fixed((H, H)),      # w2
            fixed((1, H)),      # b2
            fixed((H, Q)),      # w3 (unpadded)
            fixed((1, Q)),      # b3 (unpadded)
        ],
        out_specs=pl.BlockSpec((TB, Q), lambda i: (i, 0)),
    )

    wt_itemsize = jnp.dtype(w1s.dtype).itemsize
    out_itemsize = jnp.dtype(out_dtype).itemsize
    weight_bytes = ((w1s.size + w1c.size + w2.size + w3.size) * wt_itemsize
                    + (b1.size + b2.size + b3.size) * 4)
    cost = pl.CostEstimate(
        flops=2 * B * (S * H + C * H + H * H + H * Q),
        transcendentals=0,
        bytes_accessed=B * 4 * (S + C) + B * out_itemsize * Q + weight_bytes,
    )

    return pl.pallas_call(
        _q_mlp_kernel,
        out_shape=jax.ShapeDtypeStruct((B, Q), out_dtype),
        grid_spec=grid_spec,
        cost_estimate=cost,
        compiler_params=pltpu.CompilerParams(
            # batch axis is independent work -> shard across v7x's 2 TCs
            dimension_semantics=("parallel",),
            # unlock large batch tiles on v5e/v6e (16/32 MiB default scoped
            # VMEM); 48 MiB also stays under v7x's 64 MiB physical.
            vmem_limit_bytes=vmem_limit_bytes,
        ),
    )(state, c_action, w1s, w1c, b1, w2, b2, w3, b3)


def init_params(key, state_size, d_action_size, c_action_size, hidden=128,
                weight_dtype=jnp.bfloat16):
    """Deterministic synthetic parameters (no checkpoint loading).

    * w1 is pre-split into its state / c_action row blocks (fused concat).
    * w3 / b3 are kept UNPADDED — the kernel stores (TB, q_out) directly.
    * Weights are stored in bf16 (bf16 MXU path, half the weight DMA bytes);
      biases stay f32 so all elementwise work stays f32 (v5e has no bf16 VPU).
      Note: bf16 weights deviate ~1e-2 rel. from an f32 PyTorch module; keep
      weight_dtype=jnp.float32 if strict f32 parity is required.
    * NOTE (v6e/v7x sizing): with hidden=128 every dot uses N=128 — half the
      2x256-wide MXU; hidden=256 would be nearly free while memory-bound.
    """
    d_in = state_size + c_action_size
    q_out = d_action_size if d_action_size > 0 else 1

    k1, k2, k3 = jax.random.split(key, 3)
    scale = 0.05
    w1 = scale * jax.random.normal(k1, (d_in, hidden), jnp.float32)
    w2 = scale * jax.random.normal(k2, (hidden, hidden), jnp.float32)
    w3 = scale * jax.random.normal(k3, (hidden, q_out), jnp.float32)

    b1 = jnp.zeros((1, hidden), jnp.float32)
    b2 = jnp.zeros((1, hidden), jnp.float32)
    b3 = jnp.zeros((1, q_out), jnp.float32)

    params = (
        w1[:state_size].astype(weight_dtype),   # w1_s
        w1[state_size:].astype(weight_dtype),   # w1_c
        b1,
        w2.astype(weight_dtype),
        b2,
        w3.astype(weight_dtype),
        b3,
    )
    return params, q_out


if __name__ == "__main__":
    # Small shapes consistent with a hybrid-action Q model.
    batch = 8
    state_size = 32
    d_action_size = 8
    c_action_size = 8
    hidden = 128

    key = jax.random.PRNGKey(0)
    kp, ks, ka = jax.random.split(key, 3)

    params, q_out = init_params(kp, state_size, d_action_size, c_action_size,
                                hidden=hidden)
    state = jax.random.normal(ks, (batch, state_size), jnp.float32)
    c_action = jax.random.normal(ka, (batch, c_action_size), jnp.float32)

    q = q_forward(state, c_action, params)
    q = jax.block_until_ready(q)

    # Pure-JAX reference with identical numerics (bf16 MXU inputs, f32 accum).
    w1s, w1c, b1, w2, b2, w3, b3 = params
    w1 = jnp.concatenate([w1s, w1c], axis=0)
    x = jnp.concatenate([state, c_action], axis=-1).astype(w1.dtype)
    h1 = jnp.maximum(jnp.dot(x, w1, preferred_element_type=jnp.float32) + b1, 0.0)
    h2 = jnp.maximum(
        jnp.dot(h1.astype(w2.dtype), w2, preferred_element_type=jnp.float32) + b2, 0.0)
    q_ref = jnp.dot(h2.astype(w3.dtype), w3,
                    preferred_element_type=jnp.float32) + b3

    assert q.shape == (batch, d_action_size)
    assert jnp.allclose(q, q_ref, atol=2e-2, rtol=2e-2)

    print("KERNEL_OK")
</pallas_src>

<mosaic_0001>
module attributes {stable_mosaic.version = 11 : i64} {
  func.func @_q_mlp_kernel(%arg0: i32, %arg1: memref<8x32xf32, #tpu.memory_space<vmem>>, %arg2: memref<8x8xf32, #tpu.memory_space<vmem>>, %arg3: memref<32x128xbf16, #tpu.memory_space<vmem>>, %arg4: memref<8x128xbf16, #tpu.memory_space<vmem>>, %arg5: memref<1x128xf32, #tpu.memory_space<vmem>>, %arg6: memref<128x128xbf16, #tpu.memory_space<vmem>>, %arg7: memref<1x128xf32, #tpu.memory_space<vmem>>, %arg8: memref<128x8xbf16, #tpu.memory_space<vmem>>, %arg9: memref<1x8xf32, #tpu.memory_space<vmem>>, %arg10: memref<8x8xf32, #tpu.memory_space<vmem>>) attributes {dimension_semantics = [#tpu.dimension_semantics<parallel>], iteration_bounds = array<i64: 1>, scalar_prefetch = 0 : i64, scratch_operands = 0 : i64, tpu.core_type = #tpu.core_type<tc>, window_params = [{transform_indices = @transform_0, window_bounds = array<i64: 8, 32>}, {transform_indices = @transform_1, window_bounds = array<i64: 8, 8>}, {pipeline_mode = #tpu.pipeline_mode<synchronous>, transform_indices = @transform_2, window_bounds = array<i64: 32, 128>}, {pipeline_mode = #tpu.pipeline_mode<synchronous>, transform_indices = @transform_3, window_bounds = array<i64: 8, 128>}, {pipeline_mode = #tpu.pipeline_mode<synchronous>, transform_indices = @transform_4, window_bounds = array<i64: 1, 128>}, {pipeline_mode = #tpu.pipeline_mode<synchronous>, transform_indices = @transform_5, window_bounds = array<i64: 128, 128>}, {pipeline_mode = #tpu.pipeline_mode<synchronous>, transform_indices = @transform_6, window_bounds = array<i64: 1, 128>}, {pipeline_mode = #tpu.pipeline_mode<synchronous>, transform_indices = @transform_7, window_bounds = array<i64: 128, 8>}, {pipeline_mode = #tpu.pipeline_mode<synchronous>, transform_indices = @transform_8, window_bounds = array<i64: 1, 8>}, {transform_indices = @transform_9, window_bounds = array<i64: 8, 8>}]} {
    %c0 = arith.constant 0 : index
    %c0_0 = arith.constant 0 : index
    %0 = vector.load %arg1[%c0, %c0_0] : memref<8x32xf32, #tpu.memory_space<vmem>>, vector<8x32xf32>
    %1 = arith.truncf %0 : vector<8x32xf32> to vector<8x32xbf16>
    %c0_1 = arith.constant 0 : index
    %c0_2 = arith.constant 0 : index
    %2 = vector.load %arg2[%c0_1, %c0_2] : memref<8x8xf32, #tpu.memory_space<vmem>>, vector<8x8xf32>
    %3 = arith.truncf %2 : vector<8x8xf32> to vector<8x8xbf16>
    %c0_3 = arith.constant 0 : index
    %c0_4 = arith.constant 0 : index
    %4 = vector.load %arg3[%c0_3, %c0_4] : memref<32x128xbf16, #tpu.memory_space<vmem>>, vector<32x128xbf16>
    %cst = arith.constant dense<0.000000e+00> : vector<8x128xf32>
    %5 = tpu.matmul %1, %4, %cst {dimension_numbers = #tpu.dot_dimension_numbers<[1], [0], [0], [1], [0, 0, 1, 1], [], []>} : vector<8x32xbf16>, vector<32x128xbf16>, vector<8x128xf32> -> vector<8x128xf32>
    %c0_5 = arith.constant 0 : index
    %c0_6 = arith.constant 0 : index
    %6 = vector.load %arg4[%c0_5, %c0_6] : memref<8x128xbf16, #tpu.memory_space<vmem>>, vector<8x128xbf16>
    %cst_7 = arith.constant dense<0.000000e+00> : vector<8x128xf32>
    %7 = tpu.matmul %3, %6, %cst_7 {dimension_numbers = #tpu.dot_dimension_numbers<[1], [0], [0], [1], [0, 0, 1, 1], [], []>} : vector<8x8xbf16>, vector<8x128xbf16>, vector<8x128xf32> -> vector<8x128xf32>
    %8 = arith.addf %5, %7 : vector<8x128xf32>
    %c0_8 = arith.constant 0 : index
    %c0_9 = arith.constant 0 : index
    %9 = vector.load %arg5[%c0_8, %c0_9] : memref<1x128xf32, #tpu.memory_space<vmem>>, vector<1x128xf32>
    %10 = vector.broadcast %9 : vector<1x128xf32> to vector<8x128xf32>
    %11 = arith.addf %8, %10 : vector<8x128xf32>
    %cst_10 = arith.constant 0.000000e+00 : f32
    %12 = vector.broadcast %cst_10 : f32 to vector<8x128xf32>
    %13 = arith.maximumf %11, %12 : vector<8x128xf32>
    %14 = arith.truncf %13 : vector<8x128xf32> to vector<8x128xbf16>
    %c0_11 = arith.constant 0 : index
    %c0_12 = arith.constant 0 : index
    %15 = vector.load %arg6[%c0_11, %c0_12] : memref<128x128xbf16, #tpu.memory_space<vmem>>, vector<128x128xbf16>
    %cst_13 = arith.constant dense<0.000000e+00> : vector<8x128xf32>
    %16 = tpu.matmul %14, %15, %cst_13 {dimension_numbers = #tpu.dot_dimension_numbers<[1], [0], [0], [1], [0, 0, 1, 1], [], []>} : vector<8x128xbf16>, vector<128x128xbf16>, vector<8x128xf32> -> vector<8x128xf32>
    %c0_14 = arith.constant 0 : index
    %c0_15 = arith.constant 0 : index
    %17 = vector.load %arg7[%c0_14, %c0_15] : memref<1x128xf32, #tpu.memory_space<vmem>>, vector<1x128xf32>
    %18 = vector.broadcast %17 : vector<1x128xf32> to vector<8x128xf32>
    %19 = arith.addf %16, %18 : vector<8x128xf32>
    %cst_16 = arith.constant 0.000000e+00 : f32
    %20 = vector.broadcast %cst_16 : f32 to vector<8x128xf32>
    %21 = arith.maximumf %19, %20 : vector<8x128xf32>
    %22 = arith.truncf %21 : vector<8x128xf32> to vector<8x128xbf16>
    %c0_17 = arith.constant 0 : index
    %c0_18 = arith.constant 0 : index
    %23 = vector.load %arg8[%c0_17, %c0_18] : memref<128x8xbf16, #tpu.memory_space<vmem>>, vector<128x8xbf16>
    %cst_19 = arith.constant dense<0.000000e+00> : vector<8x8xf32>
    %24 = tpu.matmul %22, %23, %cst_19 {dimension_numbers = #tpu.dot_dimension_numbers<[1], [0], [0], [1], [0, 0, 1, 1], [], []>} : vector<8x128xbf16>, vector<128x8xbf16>, vector<8x8xf32> -> vector<8x8xf32>
    %c0_20 = arith.constant 0 : index
    %c0_21 = arith.constant 0 : index
    %25 = vector.load %arg9[%c0_20, %c0_21] : memref<1x8xf32, #tpu.memory_space<vmem>>, vector<1x8xf32>
    %26 = vector.broadcast %25 : vector<1x8xf32> to vector<8x8xf32>
    %27 = arith.addf %24, %26 : vector<8x8xf32>
    %c0_22 = arith.constant 0 : index
    %c0_23 = arith.constant 0 : index
    %28 = vector.load %arg10[%c0_22, %c0_23] : memref<8x8xf32, #tpu.memory_space<vmem>>, vector<8x8xf32>
    tpu.vector_store %arg10[%c0_22, %c0_23], %27 {strides = array<i32>} : memref<8x8xf32, #tpu.memory_space<vmem>>, vector<8x8xf32>,
    return
  }
  func.func @transform_0(%arg0: i32) -> (i32, i32) {
    %c0_i32 = arith.constant 0 : i32
    %c0_i32_0 = arith.constant 0 : i32
    return %arg0, %c0_i32 : i32, i32
  }
  func.func @transform_1(%arg0: i32) -> (i32, i32) {
    %c0_i32 = arith.constant 0 : i32
    %c0_i32_0 = arith.constant 0 : i32
    return %arg0, %c0_i32 : i32, i32
  }
  func.func @transform_2(%arg0: i32) -> (i32, i32) {
    %c0_i32 = arith.constant 0 : i32
    %c0_i32_0 = arith.constant 0 : i32
    %c0_i32_1 = arith.constant 0 : i32
    return %c0_i32, %c0_i32_0 : i32, i32
  }
  func.func @transform_3(%arg0: i32) -> (i32, i32) {
    %c0_i32 = arith.constant 0 : i32
    %c0_i32_0 = arith.constant 0 : i32
    %c0_i32_1 = arith.constant 0 : i32
    return %c0_i32, %c0_i32_0 : i32, i32
  }
  func.func @transform_4(%arg0: i32) -> (i32, i32) {
    %c0_i32 = arith.constant 0 : i32
    %c0_i32_0 = arith.constant 0 : i32
    %c0_i32_1 = arith.constant 0 : i32
    return %c0_i32, %c0_i32_0 : i32, i32
  }
  func.func @transform_5(%arg0: i32) -> (i32, i32) {
    %c0_i32 = arith.constant 0 : i32
    %c0_i32_0 = arith.constant 0 : i32
    %c0_i32_1 = arith.constant 0 : i32
    return %c0_i32, %c0_i32_0 : i32, i32
  }
  func.func @transform_6(%arg0: i32) -> (i32, i32) {
    %c0_i32 = arith.constant 0 : i32
    %c0_i32_0 = arith.constant 0 : i32
    %c0_i32_1 = arith.constant 0 : i32
    return %c0_i32, %c0_i32_0 : i32, i32
  }
  func.func @transform_7(%arg0: i32) -> (i32, i32) {
    %c0_i32 = arith.constant 0 : i32
    %c0_i32_0 = arith.constant 0 : i32
    %c0_i32_1 = arith.constant 0 : i32
    return %c0_i32, %c0_i32_0 : i32, i32
  }
  func.func @transform_8(%arg0: i32) -> (i32, i32) {
    %c0_i32 = arith.constant 0 : i32
    %c0_i32_0 = arith.constant 0 : i32
    %c0_i32_1 = arith.constant 0 : i32
    return %c0_i32, %c0_i32_0 : i32, i32
  }
  func.func @transform_9(%arg0: i32) -> (i32, i32) {
    %c0_i32 = arith.constant 0 : i32
    %c0_i32_0 = arith.constant 0 : i32
    return %arg0, %c0_i32 : i32, i32
  }
}

</mosaic_0001>

<bundles_post_ra>
// kernel: tpu_custom_call.1
= control target key start
LH: loop header
LB: loop body
LE: loop exit
PB: predicated region body
PF: predicated region fallthrough
CT: control target
= control target key end

     0   :  { %14 = vsyncpa [#allocation3], 0  ;;  %s702_s0 = inlined_call_operand.vmem [shape: f32[8,32], index: 0, kind: input, shape index: {}]   ;;  %s703_s1 = inlined_call_operand.hbm [shape: f32[8,8], index: 1, kind: input, shape index: {}]   ;;  %s704_s2 = inlined_call_operand.hbm [shape: bf16[32,128], index: 2, kind: input, shape index: {}]   ;;  %s705_s3 = inlined_call_operand.hbm [shape: bf16[8,128], index: 3, kind: input, shape index: {}]   ;;  %s706_s4 = inlined_call_operand.hbm [shape: f32[1,128], index: 4, kind: input, shape index: {}]   ;;  %s707_s5 = inlined_call_operand.vmem [shape: bf16[128,128], index: 5, kind: input, shape index: {}]   ;;  %s708_s6 = inlined_call_operand.vmem [shape: f32[1,128], index: 6, kind: input, shape index: {}]   ;;  %s709_s7 = inlined_call_operand.vmem [shape: bf16[128,8], index: 7, kind: input, shape index: {}]   ;;  %s710_s8 = inlined_call_operand.vmem [shape: f32[1,8], index: 8, kind: input, shape index: {}]   ;;  %s711_s9 = inlined_call_operand.hbm [shape: f32[8,8], index: 9, kind: output, shape index: {}]  }
   0x1   :  { %15 = vsyncpa [#allocation6], 0 }
   0x2   :  { %16 = vsyncpa [#allocation9], 0  ;;  %s35_s11 = sshll.u32 %s704_s2, 4  ;;  %s36_s11 = int_to_ptr.hbm [resolvable:$true] %s35_s11 }
   0x3   :  { %17 = vsyncpa [#allocation4], 0  ;;  %s571_s12 = smov [#allocation5]   ;;  %s25_s16 = sshll.u32 %s703_s1, 4  ;;  %s26_s16 = int_to_ptr.hbm [resolvable:$true] %s25_s16 }
   0x4   :  { %s37_s13 = sshll.u32 %s571_s12, 4  ;;  %s572_s17 = smov 64   ;;  %s38_s13 = int_to_ptr.vmem [resolvable:$true] %s37_s13 }
   0x5   :  { %s573_s18 = smov 4   ;;  %s574_s19 = smov [#allocation2]  }
   0x6   :  { %43 = dma.hbm_to_vmem [thread:$0]  %s36_s11, 256, %s38_s13, [#allocation6], %s572_s17, %s572_s17, %s573_s18  }
   0x7   :  { %s27_s20 = sshll.u32 %s574_s19, 4  ;;  %s49_s23 = sshll.u32 %s705_s3, 4  ;;  %s28_s20 = int_to_ptr.vmem [resolvable:$true] %s27_s20  ;;  %s50_s23 = int_to_ptr.hbm [resolvable:$true] %s49_s23 }
   0x8   :  { %30 = dma.hbm_to_vmem [thread:$0]  %s26_s16, 128, %s28_s20, [#allocation3]  }
   0x9   :  { %s60_s25 = sshll.u32 %s706_s4, 4  ;;  %s575_s26 = smov [#allocation7]   ;;  %s61_s25 = int_to_ptr.hbm [resolvable:$true] %s60_s25 }
   0xa   :  { %s51_s27 = sshll.u32 %s575_s26, 4  ;;  %s576_s1 = smov [#allocation8]   ;;  %s52_s27 = int_to_ptr.vmem [resolvable:$true] %s51_s27 }
   0xb   :  { %54 = dma.hbm_to_vmem [thread:$0]  %s50_s23, 64, %s52_s27, [#allocation6]  }
   0xc   :  { %s62_s28 = sshll.u32 %s576_s1, 4  ;;  %s63_s28 = int_to_ptr.vmem [resolvable:$true] %s62_s28 }
   0xd   :  { %65 = dma.hbm_to_vmem [thread:$0]  %s61_s25, 16, %s63_s28, [#allocation9]  }
   0xe   :  { %563 = dma.done.wait [#allocation3], 128  }
   0xf   :  { %564 = vsyncadd [#allocation3], 4294967168 }
  0x10   :  { %565 = dma.done.wait [#allocation6], 320  }
  0x11   :  { %566 = vsyncadd [#allocation6], 4294966976 }
  0x12   :  { %567 = dma.done.wait [#allocation9], 16  }
  0x13   :  { %568 = vsyncadd [#allocation9], 4294967280  ;;  %vm104_vm0 = vcmask 1043456   ;;  %v99_v0 = vld [vmem:[#allocation7] sm:$0xf]  ;;  %v416_v1 = vld [vmem:[#allocation5 + $0x8] sm:$0xff] }
  0x14   :  { %v93_v2 = vld [vmem:[#allocation2] sm:$0xff]  ;;  %v106_v3 = vsel %vm104_vm0, %v99_v0, 0  ;;  %v424_v5 = vld [vmem:[%s707_s5 + $0x38] sm:$0xff]  ;;  %143 = vmatpush.bf16.msra.mxu1 %v416_v1  ;;  %vm100_vm1 = vcmask 64512   ;;  %v415_v6 = vld [vmem:[#allocation5] sm:$0xff]  ;;  %vm133_vm2 = vcmask 261120  }
  0x15   :  { %v94_v4 = vpack.c.bf16 %v93_v2, %v93_v2  ;;  %115 = vmatpush.bf16.msra.mxu0 %v106_v3  ;;  %v91_v7 = vld [vmem:[%s702_s0] sm:$0xff]  ;;  %225 = vmatpush.bf16.msra.mxu2 %v424_v5  ;;  %v423_v8 = vld [vmem:[%s707_s5 + $0x30] sm:$0xff]  ;;  %v422_v10 = vld [vmem:[%s707_s5 + $0x28] sm:$0xff]  ;;  %s577_s16 = smov [#allocation10]  }
  0x16   :  { %v92_v9 = vpack.c.bf16 %v91_v7, %v91_v7  ;;  %v421_v11 = vld [vmem:[%s707_s5 + $0x20] sm:$0xff]  ;;  %v420_v12 = vld [vmem:[%s707_s5 + $0x18] sm:$0xff]  ;;  %v419_v13 = vld [vmem:[%s707_s5 + $0x10] sm:$0xff]  ;;  %s327_s17 = sshll.u32 %s577_s16, 4  ;;  %s328_s17 = int_to_ptr.vmem [resolvable:$true] %s327_s17 }
  0x17   :  { %v418_v14 = vld [vmem:[%s707_s5 + $0x8] sm:$0xff]  ;;  %v417_v15 = vld [vmem:[%s707_s5] sm:$0xff]  ;;  %v432_v16 = vld [vmem:[%s709_s7 + $0x38] sm:$0xff] }
  0x18   :  { %341 = vmatmul.msk.bf16.vlgmr.msra.gmra.mxu0 %vm100_vm1, %v94_v4  ;;  %144 = vmatpush.bf16.msra.mxu1 %v415_v6  ;;  %v431_v17 = vld [vmem:[%s709_s7 + $0x30] sm:$0xff]  ;;  %v430_v18 = vld [vmem:[%s709_s7 + $0x28] sm:$0xff]  ;;  %v429_v19 = vld [vmem:[%s709_s7 + $0x20] sm:$0xff] }
  0x19   :  { %226 = vmatpush.bf16.msra.mxu2 %v423_v8  ;;  %308 = vmatpush.bf16.msra.mxu3 %v432_v16  ;;  %v428_v20 = vld [vmem:[%s709_s7 + $0x18] sm:$0xff]  ;;  %v427_v21 = vld [vmem:[%s709_s7 + $0x10] sm:$0xff]  ;;  %v426_v31 = vld [vmem:[%s709_s7 + $0x8] sm:$0xff] }
  0x1a   :  { %v440_v23 = vld [vmem:[#allocation8] ss:$0 sm:$0xff]  ;;  %v425_v32 = vld [vmem:[%s709_s7] sm:$0xff]  ;;  %s329_s7 = sshll.u32 %s711_s9, 4  ;;  %s330_s7 = int_to_ptr.hbm [resolvable:$true] %s329_s7 }
  0x1b   :  { %350 = vmatmul.msk.bf16.vlgmr.msra.gmra.mxu1 %vm133_vm2, %v92_v9  ;;  %v441_v33 = vld [vmem:[%s708_s6] ss:$0 sm:$0xff] }
  0x1c   :  { %v442_v39 = vld [vmem:[%s710_s8] ss:$0 sm:$0xff] }
  0x1d   :  { %227 = vmatpush.bf16.msra.mxu2 %v422_v10  ;;  %309 = vmatpush.bf16.msra.mxu3 %v431_v17 }
  0x21   :  { %228 = vmatpush.bf16.msra.mxu2 %v421_v11  ;;  %310 = vmatpush.bf16.msra.mxu3 %v430_v18 }
  0x25   :  { %229 = vmatpush.bf16.msra.mxu2 %v420_v12  ;;  %311 = vmatpush.bf16.msra.mxu3 %v429_v19 }
  0x29   :  { %230 = vmatpush.bf16.msra.mxu2 %v419_v13  ;;  %312 = vmatpush.bf16.msra.mxu3 %v428_v20 }
  0x2d   :  { %231 = vmatpush.bf16.msra.mxu2 %v418_v14  ;;  %313 = vmatpush.bf16.msra.mxu3 %v427_v21 }
  0x31   :  { %232 = vmatpush.bf16.msra.mxu2 %v417_v15  ;;  %314 = vmatpush.bf16.msra.mxu3 %v426_v31 }
  0x35   :  { %315 = vmatpush.bf16.msra.mxu3 %v425_v32 }
  0x95   :  { %v117_v22 = vpop.f32.mrf.mxu0 }
  0x98   :  { %v146_v24 = vpop.f32.mrf.mxu1 }
  0x99   :  { %v147_v25 = vadd.f32 %v146_v24, %v117_v22 }
  0x9b   :  { %v154_v26 = vadd.f32 %v440_v23, %v147_v25 }
  0x9d   :  { %v119_v27 = vpop.f32.mrf.mxu0  ;;  %v155_v28 = vmax.f32 %v154_v26, 0.0 }
  0x9f   :  { %v156_v29 = vpack.c.bf16 %v155_v28, %v155_v28 }
  0xa0   :  { %v148_v30 = vpop.f32.mrf.mxu1 }
  0xa1   :  { %233 = vmatmul.bf16.vlgmr.msra.gmra.mxu2 %v156_v29 }
 0x124   :  { %v234_v34 = vpop.f32.mrf.mxu2 }
 0x125   :  { %v235_v35 = vadd.f32 %v441_v33, %v234_v34 }
 0x127   :  { %v238_v36 = vmax.f32 %v235_v35, 0.0 }
 0x129   :  { %v239_v37 = vpack.c.bf16 %v238_v36, %v238_v36 }
 0x12b   :  { %316 = vmatmul.bf16.vlgmr.msra.gmra.mxu3 %v239_v37 }
 0x12c   :  { %v236_v38 = vpop.f32.mrf.mxu2 }
 0x1ae   :  { %v317_v40 = vpop.f32.mrf.mxu3 }
 0x1af   :  { %v318_v41 = vadd.f32 %v442_v39, %v317_v40 }
 0x1b1   :  { %321 = vst.msk [vmem:[#allocation10] sm:$0xff] %vm100_vm1, %v318_v41 }
 0x1b2   :  { %332 = dma.vmem_to_hbm [thread:$0]  %s328_s17, 128, %s330_s7, [#allocation4]  }
 0x1b6   :  { %v319_v42 = vpop.f32.mrf.mxu3 }
 0x1b7   :  { %569 = dma.done.wait [#allocation4], 128  }
 0x1b8   :  { %570 = vsyncadd [#allocation4], 4294967168 }
 0x1b9   :  { %337 = vsyncpa [#allocation3], 1 }
 0x1ba   :  { %338 = vsyncpa [#allocation6], 1 }
 0x1bb   :  { %339 = vsyncpa [#allocation9], 1 }
 0x1bc   :  { %340 = vsyncpa [#allocation4], 1 }

</bundles_post_ra>
